<compile_context>
chip_gen: v7x
topology: tpu7x:2x2x1
jax: 0.10.0
libtpu: 0.0.40
codegen_flags: <defaults>
</compile_context>

<pallas_src>
import jax
import jax.numpy as jnp
from jax.experimental import pallas as pl
from jax.experimental.pallas import tpu as pltpu

HIDDEN = 256
LANE = 128


def _round_up(n, m):
    return (n + m - 1) // m * m


def dqn_mlp_kernel(x_ref, w1_ref, b1_ref, w2_ref, b2_ref, w3_ref, b3_ref, o_ref):
    # x tile: (TB, state_dim) f32 -> bf16 for the MXU; weights bf16; biases f32;
    # all matmuls accumulate in f32 via preferred_element_type.
    x = x_ref[...].astype(jnp.bfloat16)

    # fc1 + relu
    # TODO(synk): K=state_dim=16 underfills the MXU contraction (128/256 wide); if a
    # bundle dump shows fc1's vmatmul share rivaling fc3's on v5e, consider doing fc1
    # as 16 broadcast-FMAs on the (otherwise idle) VPU instead.
    h1 = jnp.dot(x, w1_ref[...], preferred_element_type=jnp.float32) + b1_ref[...]
    h1 = jnp.maximum(h1, 0.0).astype(jnp.bfloat16)

    # fc2 + relu  (dominant FLOPs: 256x256)
    h2 = jnp.dot(h1, w2_ref[...], preferred_element_type=jnp.float32) + b2_ref[...]
    h2 = jnp.maximum(h2, 0.0).astype(jnp.bfloat16)

    # fc3: the MXU runs on the 128-lane-padded W3, but only the real action_dim
    # columns are stored (narrow output -> minimal HBM writeback).
    out = jnp.dot(h2, w3_ref[...], preferred_element_type=jnp.float32) + b3_ref[...]
    action_dim = o_ref.shape[-1]
    o_ref[...] = out[:, :action_dim].astype(o_ref.dtype)


def dqn_forward(x, kernel_params, *, tile_batch=2048):
    """x: (batch, state_dim) f32 -> (batch, action_dim) f32."""
    w1, b1, w2, b2, w3, b3, action_dim = kernel_params
    batch, state_dim = x.shape
    out_pad = w3.shape[1]  # action_dim rounded up to 128 lanes (MXU side only)

    # Tile choice: big tiles amortize the ~0.35us per-grid-step overhead; splitting
    # into >= 2 tiles when there is enough work lets v7x's two TensorCores both run.
    half = _round_up(pl.cdiv(batch, 2), 16)
    tb = min(tile_batch, half)
    if tb >= batch:
        tb = batch  # single tile; block == full array dim is always legal
    grid = (pl.cdiv(batch, tb),)

    flops = 2 * batch * (state_dim * HIDDEN + HIDDEN * HIDDEN + HIDDEN * out_pad)
    bytes_accessed = (
        x.size * 4
        + (w1.size + w2.size + w3.size) * 2
        + (b1.size + b2.size + b3.size) * 4
        + batch * action_dim * 4
    )

    def resident(a):
        # Same block every grid step -> stays VMEM-resident across the whole call.
        # (pipeline_mode=pl.Buffered(1) would drop the second buffer copy, but the
        # weights total ~200 KB bf16, so the saving is negligible here.)
        return pl.BlockSpec(a.shape, lambda i: (0,) * a.ndim)

    return pl.pallas_call(
        dqn_mlp_kernel,
        out_shape=jax.ShapeDtypeStruct((batch, action_dim), jnp.float32),
        grid_spec=pltpu.PrefetchScalarGridSpec(
            num_scalar_prefetch=0,
            grid=grid,
            in_specs=[
                pl.BlockSpec((tb, state_dim), lambda i: (i, 0)),  # x tile streams
                resident(w1), resident(b1),
                resident(w2), resident(b2),
                resident(w3), resident(b3),
            ],
            # Narrow output block: last block dim == full array dim (action_dim).
            out_specs=pl.BlockSpec((tb, action_dim), lambda i: (i, 0)),
        ),
        compiler_params=pltpu.CompilerParams(
            # Batch tiles are independent -> shard across v7x's 2 TensorCores.
            dimension_semantics=("parallel",),
            # TB=2048 keeps VMEM ~10 MiB: under v5e's 16 MiB default scoped limit and
            # v6e/v7x's 32 MiB. Set vmem_limit_bytes explicitly only if tile_batch grows.
        ),
        cost_estimate=pl.CostEstimate(
            flops=flops, transcendentals=0, bytes_accessed=bytes_accessed),
    )(x, w1, b1, w2, b2, w3, b3)


def init_params(key, state_dim, action_dim, hidden=HIDDEN):
    # Mimics PyTorch nn.Linear default init: uniform(-k, k), k = 1/sqrt(fan_in).
    # Weights stored as (in, out) in f32 (master copy).
    def linear(key, fan_in, fan_out):
        kw, kb = jax.random.split(key)
        bound = 1.0 / jnp.sqrt(fan_in)
        w = jax.random.uniform(kw, (fan_in, fan_out), jnp.float32, -bound, bound)
        b = jax.random.uniform(kb, (1, fan_out), jnp.float32, -bound, bound)
        return w, b

    k1, k2, k3 = jax.random.split(key, 3)
    w1, b1 = linear(k1, state_dim, hidden)
    w2, b2 = linear(k2, hidden, hidden)
    w3, b3 = linear(k3, hidden, action_dim)
    return (w1, b1, w2, b2, w3, b3)


def pack_params(params):
    # Kernel-side params: bf16 weights, f32 biases, W3/b3 zero-padded to 128 lanes
    # (MXU-facing only; the padded lanes never reach HBM output).
    w1, b1, w2, b2, w3, b3 = params
    action_dim = w3.shape[1]
    out_pad = _round_up(action_dim, LANE)
    w3p = jnp.pad(w3, ((0, 0), (0, out_pad - action_dim)))
    b3p = jnp.pad(b3, ((0, 0), (0, out_pad - action_dim)))
    return (w1.astype(jnp.bfloat16), b1,
            w2.astype(jnp.bfloat16), b2,
            w3p.astype(jnp.bfloat16), b3p,
            action_dim)


def reference_forward(x, params):
    w1, b1, w2, b2, w3, b3 = params
    h1 = jnp.maximum(x @ w1 + b1, 0.0)
    h2 = jnp.maximum(h1 @ w2 + b2, 0.0)
    return h2 @ w3 + b3


if __name__ == "__main__":
    key = jax.random.PRNGKey(0)
    kx, kp, kx2 = jax.random.split(key, 3)

    batch, state_dim, action_dim = 4, 16, 4
    x = jax.random.normal(kx, (batch, state_dim), jnp.float32)
    params = init_params(kp, state_dim, action_dim)
    kparams = pack_params(params)

    # Small batch: single tile, grid=(1,), block == full array dims.
    out = jax.block_until_ready(dqn_forward(x, kparams))
    ref = reference_forward(x, params)
    assert out.shape == (batch, action_dim)
    # bf16 weights/activations with f32 accumulation -> small drift vs f32 ref.
    assert jnp.allclose(out, ref, atol=2e-2, rtol=2e-2), float(
        jnp.max(jnp.abs(out - ref)))

    # Larger batch exercising the tiled path: grid=(2,) with a partial last block.
    batch2 = 40
    x2 = jax.random.normal(kx2, (batch2, state_dim), jnp.float32)
    out2 = jax.block_until_ready(dqn_forward(x2, kparams))
    ref2 = reference_forward(x2, params)
    assert out2.shape == (batch2, action_dim)
    assert jnp.allclose(out2, ref2, atol=2e-2, rtol=2e-2), float(
        jnp.max(jnp.abs(out2 - ref2)))

    print("KERNEL_OK")
</pallas_src>

<mosaic_0001>
module attributes {stable_mosaic.version = 11 : i64} {
  func.func @dqn_mlp_kernel(%arg0: i32, %arg1: memref<4x16xf32, #tpu.memory_space<vmem>>, %arg2: memref<16x256xbf16, #tpu.memory_space<vmem>>, %arg3: memref<1x256xf32, #tpu.memory_space<vmem>>, %arg4: memref<256x256xbf16, #tpu.memory_space<vmem>>, %arg5: memref<1x256xf32, #tpu.memory_space<vmem>>, %arg6: memref<256x128xbf16, #tpu.memory_space<vmem>>, %arg7: memref<1x128xf32, #tpu.memory_space<vmem>>, %arg8: memref<4x4xf32, #tpu.memory_space<vmem>>) attributes {dimension_semantics = [#tpu.dimension_semantics<parallel>], iteration_bounds = array<i64: 1>, scalar_prefetch = 0 : i64, scratch_operands = 0 : i64, tpu.core_type = #tpu.core_type<tc>, window_params = [{transform_indices = @transform_0, window_bounds = array<i64: 4, 16>}, {pipeline_mode = #tpu.pipeline_mode<synchronous>, transform_indices = @transform_1, window_bounds = array<i64: 16, 256>}, {pipeline_mode = #tpu.pipeline_mode<synchronous>, transform_indices = @transform_2, window_bounds = array<i64: 1, 256>}, {pipeline_mode = #tpu.pipeline_mode<synchronous>, transform_indices = @transform_3, window_bounds = array<i64: 256, 256>}, {pipeline_mode = #tpu.pipeline_mode<synchronous>, transform_indices = @transform_4, window_bounds = array<i64: 1, 256>}, {pipeline_mode = #tpu.pipeline_mode<synchronous>, transform_indices = @transform_5, window_bounds = array<i64: 256, 128>}, {pipeline_mode = #tpu.pipeline_mode<synchronous>, transform_indices = @transform_6, window_bounds = array<i64: 1, 128>}, {transform_indices = @transform_7, window_bounds = array<i64: 4, 4>}]} {
    %c0 = arith.constant 0 : index
    %c0_0 = arith.constant 0 : index
    %0 = vector.load %arg1[%c0, %c0_0] : memref<4x16xf32, #tpu.memory_space<vmem>>, vector<4x16xf32>
    %1 = arith.truncf %0 : vector<4x16xf32> to vector<4x16xbf16>
    %c0_1 = arith.constant 0 : index
    %c0_2 = arith.constant 0 : index
    %2 = vector.load %arg2[%c0_1, %c0_2] : memref<16x256xbf16, #tpu.memory_space<vmem>>, vector<16x256xbf16>
    %cst = arith.constant dense<0.000000e+00> : vector<4x256xf32>
    %3 = tpu.matmul %1, %2, %cst {dimension_numbers = #tpu.dot_dimension_numbers<[1], [0], [0], [1], [0, 0, 1, 1], [], []>} : vector<4x16xbf16>, vector<16x256xbf16>, vector<4x256xf32> -> vector<4x256xf32>
    %c0_3 = arith.constant 0 : index
    %c0_4 = arith.constant 0 : index
    %4 = vector.load %arg3[%c0_3, %c0_4] : memref<1x256xf32, #tpu.memory_space<vmem>>, vector<1x256xf32>
    %5 = vector.broadcast %4 : vector<1x256xf32> to vector<4x256xf32>
    %6 = arith.addf %3, %5 : vector<4x256xf32>
    %cst_5 = arith.constant 0.000000e+00 : f32
    %7 = vector.broadcast %cst_5 : f32 to vector<4x256xf32>
    %8 = arith.maximumf %6, %7 : vector<4x256xf32>
    %9 = arith.truncf %8 : vector<4x256xf32> to vector<4x256xbf16>
    %c0_6 = arith.constant 0 : index
    %c0_7 = arith.constant 0 : index
    %10 = vector.load %arg4[%c0_6, %c0_7] : memref<256x256xbf16, #tpu.memory_space<vmem>>, vector<256x256xbf16>
    %cst_8 = arith.constant dense<0.000000e+00> : vector<4x256xf32>
    %11 = tpu.matmul %9, %10, %cst_8 {dimension_numbers = #tpu.dot_dimension_numbers<[1], [0], [0], [1], [0, 0, 1, 1], [], []>} : vector<4x256xbf16>, vector<256x256xbf16>, vector<4x256xf32> -> vector<4x256xf32>
    %c0_9 = arith.constant 0 : index
    %c0_10 = arith.constant 0 : index
    %12 = vector.load %arg5[%c0_9, %c0_10] : memref<1x256xf32, #tpu.memory_space<vmem>>, vector<1x256xf32>
    %13 = vector.broadcast %12 : vector<1x256xf32> to vector<4x256xf32>
    %14 = arith.addf %11, %13 : vector<4x256xf32>
    %cst_11 = arith.constant 0.000000e+00 : f32
    %15 = vector.broadcast %cst_11 : f32 to vector<4x256xf32>
    %16 = arith.maximumf %14, %15 : vector<4x256xf32>
    %17 = arith.truncf %16 : vector<4x256xf32> to vector<4x256xbf16>
    %c0_12 = arith.constant 0 : index
    %c0_13 = arith.constant 0 : index
    %18 = vector.load %arg6[%c0_12, %c0_13] : memref<256x128xbf16, #tpu.memory_space<vmem>>, vector<256x128xbf16>
    %cst_14 = arith.constant dense<0.000000e+00> : vector<4x128xf32>
    %19 = tpu.matmul %17, %18, %cst_14 {dimension_numbers = #tpu.dot_dimension_numbers<[1], [0], [0], [1], [0, 0, 1, 1], [], []>} : vector<4x256xbf16>, vector<256x128xbf16>, vector<4x128xf32> -> vector<4x128xf32>
    %c0_15 = arith.constant 0 : index
    %c0_16 = arith.constant 0 : index
    %20 = vector.load %arg7[%c0_15, %c0_16] : memref<1x128xf32, #tpu.memory_space<vmem>>, vector<1x128xf32>
    %21 = vector.broadcast %20 : vector<1x128xf32> to vector<4x128xf32>
    %22 = arith.addf %19, %21 : vector<4x128xf32>
    %23 = vector.extract_strided_slice %22 {offsets = [0, 0], sizes = [4, 4], strides = [1, 1]} : vector<4x128xf32> to vector<4x4xf32>
    %c0_17 = arith.constant 0 : index
    %c0_18 = arith.constant 0 : index
    %24 = vector.load %arg8[%c0_17, %c0_18] : memref<4x4xf32, #tpu.memory_space<vmem>>, vector<4x4xf32>
    tpu.vector_store %arg8[%c0_17, %c0_18], %23 {strides = array<i32>} : memref<4x4xf32, #tpu.memory_space<vmem>>, vector<4x4xf32>,
    return
  }
  func.func @transform_0(%arg0: i32) -> (i32, i32) {
    %c0_i32 = arith.constant 0 : i32
    %c0_i32_0 = arith.constant 0 : i32
    return %arg0, %c0_i32 : i32, i32
  }
  func.func @transform_1(%arg0: i32) -> (i32, i32) {
    %c0_i32 = arith.constant 0 : i32
    %c0_i32_0 = arith.constant 0 : i32
    %c0_i32_1 = arith.constant 0 : i32
    return %c0_i32, %c0_i32_0 : i32, i32
  }
  func.func @transform_2(%arg0: i32) -> (i32, i32) {
    %c0_i32 = arith.constant 0 : i32
    %c0_i32_0 = arith.constant 0 : i32
    %c0_i32_1 = arith.constant 0 : i32
    return %c0_i32, %c0_i32_0 : i32, i32
  }
  func.func @transform_3(%arg0: i32) -> (i32, i32) {
    %c0_i32 = arith.constant 0 : i32
    %c0_i32_0 = arith.constant 0 : i32
    %c0_i32_1 = arith.constant 0 : i32
    return %c0_i32, %c0_i32_0 : i32, i32
  }
  func.func @transform_4(%arg0: i32) -> (i32, i32) {
    %c0_i32 = arith.constant 0 : i32
    %c0_i32_0 = arith.constant 0 : i32
    %c0_i32_1 = arith.constant 0 : i32
    return %c0_i32, %c0_i32_0 : i32, i32
  }
  func.func @transform_5(%arg0: i32) -> (i32, i32) {
    %c0_i32 = arith.constant 0 : i32
    %c0_i32_0 = arith.constant 0 : i32
    %c0_i32_1 = arith.constant 0 : i32
    return %c0_i32, %c0_i32_0 : i32, i32
  }
  func.func @transform_6(%arg0: i32) -> (i32, i32) {
    %c0_i32 = arith.constant 0 : i32
    %c0_i32_0 = arith.constant 0 : i32
    %c0_i32_1 = arith.constant 0 : i32
    return %c0_i32, %c0_i32_0 : i32, i32
  }
  func.func @transform_7(%arg0: i32) -> (i32, i32) {
    %c0_i32 = arith.constant 0 : i32
    %c0_i32_0 = arith.constant 0 : i32
    return %arg0, %c0_i32 : i32, i32
  }
}

</mosaic_0001>

<bundles_post_ra>
// kernel: tpu_custom_call.1
= control target key start
LH: loop header
LB: loop body
LE: loop exit
PB: predicated region body
PF: predicated region fallthrough
CT: control target
= control target key end

     0   :  { %12 = vsyncpa [#allocation3], 0  ;;  %s993_s0 = inlined_call_operand.hbm [shape: f32[4,16], index: 0, kind: input, shape index: {}]   ;;  %s994_s1 = inlined_call_operand.hbm [shape: bf16[16,256], index: 1, kind: input, shape index: {}]   ;;  %s995_s2 = inlined_call_operand.vmem [shape: f32[1,256], index: 2, kind: input, shape index: {}]   ;;  %s996_s3 = inlined_call_operand.hbm [shape: bf16[256,256], index: 3, kind: input, shape index: {}]   ;;  %s997_s4 = inlined_call_operand.vmem [shape: f32[1,256], index: 4, kind: input, shape index: {}]   ;;  %s998_s5 = inlined_call_operand.hbm [shape: bf16[256,128], index: 5, kind: input, shape index: {}]   ;;  %s999_s6 = inlined_call_operand.vmem [shape: f32[1,128], index: 6, kind: input, shape index: {}]   ;;  %s1000_s7 = inlined_call_operand.hbm [shape: f32[4,4], index: 7, kind: output, shape index: {}]  }
   0x1   :  { %13 = vsyncpa [#allocation6], 0 }
   0x2   :  { %14 = vsyncpa [#allocation9], 0 }
   0x3   :  { %15 = vsyncpa [#allocation4], 0  ;;  %s868_s24 = smov [#allocation5]   ;;  %s750_s28 = scalar_lea.hbm %s994_s1, 256 }
   0x4   :  { %s31_s25 = sshll.u32 %s868_s24, 4  ;;  %p751_p0 = scmp.ne.s32.totalorder %s994_s1, %s750_s28  ;;  %s32_s25 = int_to_ptr.vmem [resolvable:$true] %s31_s25 }
   0x5   :  { %p754_p1 = scmp.lt.u32.totalorder %s750_s28, %s994_s1 }
   0x7   :  { %p756_p2 = pnand %p754_p1, %p751_p0 }
   0x9   :  { %759 = shalt.err (!%p756_p2)
}
   0xa   :  { %s760_s10 = scalar_lea.vmem %s32_s25, 256  ;;  %p765_p4 = scmp.lt.s32.totalorder %s32_s25, %s32_s25 }
   0xb   :  { %p761_p3 = scmp.ne.s32.totalorder %s32_s25, %s760_s10  ;;  %p766_p5 = scmp.lt.s32.totalorder %s760_s10, %s760_s10 }
   0xd   :  { %p767_p6 = por %p766_p5, %p765_p4 }
   0xf   :  { %p768_p7 = pnand %p767_p6, %p761_p3 }
  0x11   :  { %771 = shalt.err (!%p768_p7)
}
  0x12   :  { %s869_s11 = smov 128   ;;  %s870_s12 = smov 8  }
  0x13   :  { %37 = dma.hbm_to_vmem [thread:$0]  %s994_s1, 256, %s32_s25, [#allocation6], %s869_s11, %s869_s11, %s870_s12  }
  0x14   :  { %s871_s15 = smov [#allocation2]   ;;  %s872_s17 = smov [#allocation7]  }
  0x15   :  { %s22_s16 = sshll.u32 %s871_s15, 4  ;;  %s45_s18 = sshll.u32 %s872_s17, 4  ;;  %s23_s16 = int_to_ptr.vmem [resolvable:$true] %s22_s16  ;;  %s46_s18 = int_to_ptr.vmem [resolvable:$true] %s45_s18 }
  0x16   :  { %s772_s21 = scalar_lea.hbm %s993_s0, 64 }
  0x17   :  { %p773_p8 = scmp.ne.s32.totalorder %s993_s0, %s772_s21  ;;  %p776_p9 = scmp.lt.u32.totalorder %s772_s21, %s993_s0 }
  0x19   :  { %p778_p10 = pnand %p776_p9, %p773_p8 }
  0x1b   :  { %781 = shalt.err (!%p778_p10)
}
  0x1c   :  { %s782_s1 = scalar_lea.vmem %s23_s16, 64  ;;  %p787_p12 = scmp.lt.s32.totalorder %s23_s16, %s23_s16 }
  0x1d   :  { %p783_p11 = scmp.ne.s32.totalorder %s23_s16, %s782_s1  ;;  %p788_p13 = scmp.lt.s32.totalorder %s782_s1, %s782_s1 }
  0x1f   :  { %p789_p0 = por %p788_p13, %p787_p12 }
  0x21   :  { %p790_p1 = pnand %p789_p0, %p783_p11 }
  0x23   :  { %793 = shalt.err (!%p790_p1)
}
  0x24   :  { %25 = dma.hbm_to_vmem [thread:$0]  %s993_s0, 64, %s23_s16, [#allocation3]  }
  0x25   :  { %s794_s30 = scalar_lea.hbm %s996_s3, 4096 }
  0x26   :  { %p795_p2 = scmp.ne.s32.totalorder %s996_s3, %s794_s30  ;;  %p798_p3 = scmp.lt.u32.totalorder %s794_s30, %s996_s3 }
  0x28   :  { %p800_p4 = pnand %p798_p3, %p795_p2 }
  0x2a   :  { %803 = shalt.err (!%p800_p4)
}
  0x2b   :  { %s804_s14 = scalar_lea.vmem %s46_s18, 4096  ;;  %p809_p6 = scmp.lt.s32.totalorder %s46_s18, %s46_s18 }
  0x2c   :  { %p805_p5 = scmp.ne.s32.totalorder %s46_s18, %s804_s14  ;;  %p810_p7 = scmp.lt.s32.totalorder %s804_s14, %s804_s14 }
  0x2e   :  { %p811_p8 = por %p810_p7, %p809_p6 }
  0x30   :  { %p812_p9 = pnand %p811_p8, %p805_p5 }
  0x32   :  { %815 = shalt.err (!%p812_p9)
}
  0x33   :  { %51 = dma.hbm_to_vmem [thread:$0]  %s996_s3, 4096, %s46_s18, [#allocation6], %s869_s11, %s869_s11, %s870_s12  }
  0x34   :  { %s873_s16 = smov [#allocation8]   ;;  %s816_s21 = scalar_lea.hbm %s998_s5, 2048 }
  0x35   :  { %s59_s17 = sshll.u32 %s873_s16, 4  ;;  %p817_p10 = scmp.ne.s32.totalorder %s998_s5, %s816_s21  ;;  %s60_s17 = int_to_ptr.vmem [resolvable:$true] %s59_s17 }
  0x36   :  { %p820_p11 = scmp.lt.u32.totalorder %s816_s21, %s998_s5 }
  0x38   :  { %p822_p12 = pnand %p820_p11, %p817_p10 }
  0x3a   :  { %825 = shalt.err (!%p822_p12)
}
  0x3b   :  { %s826_s1 = scalar_lea.vmem %s60_s17, 2048  ;;  %p831_p0 = scmp.lt.s32.totalorder %s60_s17, %s60_s17 }
  0x3c   :  { %p827_p13 = scmp.ne.s32.totalorder %s60_s17, %s826_s1  ;;  %p832_p1 = scmp.lt.s32.totalorder %s826_s1, %s826_s1 }
  0x3e   :  { %p833_p2 = por %p832_p1, %p831_p0 }
  0x40   :  { %p834_p3 = pnand %p833_p2, %p827_p13 }
  0x42   :  { %837 = shalt.err (!%p834_p3)
}
  0x43   :  { %s874_s3 = smov 64   ;;  %s875_s11 = smov 4  }
  0x44   :  { %65 = dma.hbm_to_vmem [thread:$0]  %s998_s5, 2048, %s60_s17, [#allocation9], %s874_s3, %s874_s3, %s875_s11  }
  0x45   :  { %860 = dma.done.wait [#allocation3], 64  }
  0x46   :  { %861 = vsyncadd [#allocation3], 4294967232 }
  0x47   :  { %862 = dma.done.wait [#allocation6], 4352  }
  0x48   :  { %863 = vsyncadd [#allocation6], 4294962944 }
  0x49   :  { %864 = dma.done.wait [#allocation9], 2048  }
  0x4a   :  { %865 = vsyncadd [#allocation9], 4294965248  ;;  %v876_v0 = vmov 0   ;;  %v683_v1 = vld [vmem:[#allocation5 + $0x4] ss:$8 sps:$4 sm:$0xff]   ;;  %vm107_vm0 = vcmask 130048   ;;  %v87_v49 = vlaneseq }
  0x4b   :  { %143 = vmatprep.mubr.bf16.mxu0 %v876_v0  ;;  %v685_v2 = vld [vmem:[#allocation5] ss:$8 sps:$4 sm:$0xff]   ;;  %v81_v3 = vld [vmem:[#allocation2] sm:$0xf]  ;;  %111 = vmatprep.subr.bf16.mxu0 %v683_v1  ;;  %v688_v6 = vld [vmem:[#allocation7] ss:$8 sps:$4 sm:$0xff]  }
  0x4c   :  { %v82_v4 = vpack.c.bf16 %v81_v3, %v81_v3  ;;  %v686_v5 = vld [vmem:[#allocation7 + $0x4] ss:$8 sps:$4 sm:$0xff]   ;;  %112 = vmatpush1.bf16.msra.mxu0 %v685_v2  ;;  %v689_v7 = vld [vmem:[#allocation7 + $0x14] ss:$8 sps:$4 sm:$0xff]   ;;  %v691_v8 = vld [vmem:[#allocation7 + $0x10] ss:$8 sps:$4 sm:$0xff]  }
  0x4d   :  { %360 = vmatprep.subr.bf16.mxu1 %v686_v5  ;;  %v692_v9 = vld [vmem:[#allocation7 + $0x24] ss:$8 sps:$4 sm:$0xff]   ;;  %v694_v10 = vld [vmem:[#allocation7 + $0x20] ss:$8 sps:$4 sm:$0xff]   ;;  %v695_v11 = vld [vmem:[#allocation7 + $0x34] ss:$8 sps:$4 sm:$0xff]  }
  0x4e   :  { %361 = vmatpush1.bf16.msra.mxu1 %v688_v6  ;;  %v697_v12 = vld [vmem:[#allocation7 + $0x30] ss:$8 sps:$4 sm:$0xff]   ;;  %v698_v13 = vld [vmem:[#allocation7 + $0x44] ss:$8 sps:$4 sm:$0xff]   ;;  %v700_v14 = vld [vmem:[#allocation7 + $0x40] ss:$8 sps:$4 sm:$0xff]  }
  0x4f   :  { %601 = vmatmul.mubr.msk.bf16.vlgmr.msra.gmra.mrb[0].mxu0 %vm107_vm0, %v82_v4  ;;  %362 = vmatprep.subr.bf16.mxu1 %v689_v7  ;;  %v701_v15 = vld [vmem:[#allocation7 + $0x54] ss:$8 sps:$4 sm:$0xff]   ;;  %v703_v16 = vld [vmem:[#allocation7 + $0x50] ss:$8 sps:$4 sm:$0xff]   ;;  %v704_v17 = vld [vmem:[#allocation7 + $0x64] ss:$8 sps:$4 sm:$0xff]  }
  0x50   :  { %v706_v18 = vld [vmem:[#allocation7 + $0x60] ss:$8 sps:$4 sm:$0xff]   ;;  %v707_v19 = vld [vmem:[#allocation7 + $0x74] ss:$8 sps:$4 sm:$0xff]   ;;  %v709_v20 = vld [vmem:[#allocation7 + $0x70] ss:$8 sps:$4 sm:$0xff]  }
  0x51   :  { %v710_v21 = vld [vmem:[#allocation7 + $0x84] ss:$8 sps:$4 sm:$0xff]   ;;  %v712_v22 = vld [vmem:[#allocation7 + $0x80] ss:$8 sps:$4 sm:$0xff]   ;;  %v713_v23 = vld [vmem:[#allocation7 + $0x94] ss:$8 sps:$4 sm:$0xff]  }
  0x52   :  { %363 = vmatpush1.bf16.msra.mxu1 %v691_v8  ;;  %v715_v24 = vld [vmem:[#allocation7 + $0x90] ss:$8 sps:$4 sm:$0xff]   ;;  %v716_v25 = vld [vmem:[#allocation7 + $0xa4] ss:$8 sps:$4 sm:$0xff]   ;;  %v718_v26 = vld [vmem:[#allocation7 + $0xa0] ss:$8 sps:$4 sm:$0xff]  }
  0x53   :  { %364 = vmatprep.subr.bf16.mxu1 %v692_v9  ;;  %v719_v27 = vld [vmem:[#allocation7 + $0xb4] ss:$8 sps:$4 sm:$0xff]   ;;  %v721_v28 = vld [vmem:[#allocation7 + $0xb0] ss:$8 sps:$4 sm:$0xff]   ;;  %v722_v29 = vld [vmem:[#allocation7 + $0xc4] ss:$8 sps:$4 sm:$0xff]  }
  0x54   :  { %v724_v30 = vld [vmem:[#allocation7 + $0xc0] ss:$8 sps:$4 sm:$0xff]   ;;  %v725_v31 = vld [vmem:[#allocation7 + $0xd4] ss:$8 sps:$4 sm:$0xff]   ;;  %v727_v32 = vld [vmem:[#allocation7 + $0xd0] ss:$8 sps:$4 sm:$0xff]  }
  0x55   :  { %v728_v33 = vld [vmem:[#allocation7 + $0xe4] ss:$8 sps:$4 sm:$0xff]   ;;  %v730_v34 = vld [vmem:[#allocation7 + $0xe0] ss:$8 sps:$4 sm:$0xff]   ;;  %v731_v35 = vld [vmem:[#allocation7 + $0xf4] ss:$8 sps:$4 sm:$0xff]  }
  0x56   :  { %365 = vmatpush1.bf16.msra.mxu1 %v694_v10  ;;  %v733_v36 = vld [vmem:[#allocation7 + $0xf0] ss:$8 sps:$4 sm:$0xff]   ;;  %v734_v37 = vld [vmem:[#allocation8 + $0x40] sm:$0xff]   ;;  %v736_v39 = vld [vmem:[#allocation8 + $0x48] sm:$0xff]   ;;  %v88_v50 = vshrl.u32 %v87_v49, 7  ;;  %vm580_vm1 = vcmask 27648  }
  0x57   :  { %366 = vmatprep.subr.bf16.mxu1 %v695_v11  ;;  %v735_v38 = vld [vmem:[#allocation8] sm:$0xff]   ;;  %651 = vmatprep.subr.bf16.mxu0 %v734_v37  ;;  %v737_v40 = vld [vmem:[#allocation8 + $0x8] sm:$0xff]   ;;  %v738_v41 = vld [vmem:[#allocation8 + $0x50] sm:$0xff]  }
  0x58   :  { %652 = vmatpush3.bf16.msra.mxu0 %v735_v38  ;;  %v739_v42 = vld [vmem:[#allocation8 + $0x10] sm:$0xff]   ;;  %v740_v43 = vld [vmem:[#allocation8 + $0x58] sm:$0xff]   ;;  %v742_v45 = vld [vmem:[#allocation8 + $0x60] sm:$0xff]   ;;  %v89_v51 = vsub.s32 0, %v88_v50  ;;  %v93_v53 = vsub.s32 1, %v88_v50 }
  0x59   :  { %653 = vmatprep.subr.bf16.mxu0 %v736_v39  ;;  %v741_v44 = vld [vmem:[#allocation8 + $0x18] sm:$0xff]   ;;  %v743_v46 = vld [vmem:[#allocation8 + $0x20] sm:$0xff]   ;;  %v744_v47 = vld [vmem:[#allocation8 + $0x68] sm:$0xff]  }
  0x5a   :  { %367 = vmatpush1.bf16.msra.mxu1 %v697_v12  ;;  %v745_v48 = vld [vmem:[#allocation8 + $0x28] sm:$0xff]   ;;  %v746_v2 = vld [vmem:[#allocation8 + $0x70] sm:$0xff]   ;;  %v748_v4 = vld [vmem:[#allocation8 + $0x78] sm:$0xff]  }
  0x5b   :  { %368 = vmatprep.subr.bf16.mxu1 %v698_v13  ;;  %v85_v52 = vld [vmem:[%s995_s2] sm:$0x3]  ;;  %v747_v3 = vld [vmem:[#allocation8 + $0x30] sm:$0xff]   ;;  %v749_v5 = vld [vmem:[#allocation8 + $0x38] sm:$0xff]  }
  0x5c   :  { %654 = vmatpush3.bf16.msra.mxu0 %v737_v40  ;;  %v90_v54 = vrot.slane %v85_v52, %v89_v51  ;;  %v94_v55 = vrot.slane %v85_v52, %v93_v53  ;;  %v188_v6 = vld [vmem:[%s997_s4] sm:$0x3]  ;;  %s877_s4 = smov [#allocation10]  }
  0x5d   :  { %655 = vmatprep.subr.bf16.mxu0 %v738_v41  ;;  %v193_v7 = vrot.slane %v188_v6, %v89_v51  ;;  %v197_v8 = vrot.slane %v188_v6, %v93_v53  ;;  %s588_s30 = sshll.u32 %s877_s4, 4  ;;  %s589_s30 = int_to_ptr.vmem [resolvable:$true] %s588_s30 }
  0x5e   :  { %369 = vmatpush1.bf16.msra.mxu1 %v700_v14  ;;  %s838_s8 = scalar_lea.vmem %s589_s30, 64  ;;  %p843_p5 = scmp.lt.s32.totalorder %s589_s30, %s589_s30 }
  0x5f   :  { %370 = vmatprep.subr.bf16.mxu1 %v701_v15  ;;  %p839_p4 = scmp.ne.s32.totalorder %s589_s30, %s838_s8  ;;  %p844_p6 = scmp.lt.s32.totalorder %s838_s8, %s838_s8 }
  0x60   :  { %656 = vmatpush3.bf16.msra.mxu0 %v739_v42 }
  0x61   :  { %657 = vmatprep.subr.bf16.mxu0 %v740_v43  ;;  %p845_p7 = por %p844_p6, %p843_p5 }
  0x62   :  { %371 = vmatpush1.bf16.msra.mxu1 %v703_v16 }
  0x63   :  { %372 = vmatprep.subr.bf16.mxu1 %v704_v17  ;;  %p846_p8 = pnand %p845_p7, %p839_p4 }
  0x64   :  { %658 = vmatpush3.bf16.msra.mxu0 %v741_v44 }
  0x65   :  { %659 = vmatprep.subr.bf16.mxu0 %v742_v45 }
  0x66   :  { %373 = vmatpush1.bf16.msra.mxu1 %v706_v18 }
  0x67   :  { %374 = vmatprep.subr.bf16.mxu1 %v707_v19 }
  0x68   :  { %660 = vmatpush3.bf16.msra.mxu0 %v743_v46 }
  0x69   :  { %661 = vmatprep.subr.bf16.mxu0 %v744_v47 }
  0x6a   :  { %375 = vmatpush1.bf16.msra.mxu1 %v709_v20  ;;  %v634_v20 = vld [vmem:[%s999_s6] ss:$0 sm:$0xff] }
  0x6b   :  { %376 = vmatprep.subr.bf16.mxu1 %v710_v21 }
  0x6c   :  { %662 = vmatpush3.bf16.msra.mxu0 %v745_v48 }
  0x6d   :  { %663 = vmatprep.subr.bf16.mxu0 %v746_v2 }
  0x6e   :  { %377 = vmatpush1.bf16.msra.mxu1 %v712_v22 }
  0x6f   :  { %378 = vmatprep.subr.bf16.mxu1 %v713_v23 }
  0x70   :  { %664 = vmatpush3.bf16.msra.mxu0 %v747_v3 }
  0x71   :  { %665 = vmatprep.subr.bf16.mxu0 %v748_v4 }
  0x72   :  { %379 = vmatpush1.bf16.msra.mxu1 %v715_v24 }
  0x73   :  { %380 = vmatprep.subr.bf16.mxu1 %v716_v25 }
  0x74   :  { %666 = vmatpush3.bf16.msra.mxu0 %v749_v5 }
  0x76   :  { %381 = vmatpush1.bf16.msra.mxu1 %v718_v26 }
  0x77   :  { %382 = vmatprep.subr.bf16.mxu1 %v719_v27 }
  0x7a   :  { %383 = vmatpush1.bf16.msra.mxu1 %v721_v28 }
  0x7b   :  { %384 = vmatprep.subr.bf16.mxu1 %v722_v29 }
  0x7e   :  { %385 = vmatpush1.bf16.msra.mxu1 %v724_v30 }
  0x7f   :  { %386 = vmatprep.subr.bf16.mxu1 %v725_v31 }
  0x82   :  { %387 = vmatpush1.bf16.msra.mxu1 %v727_v32 }
  0x83   :  { %388 = vmatprep.subr.bf16.mxu1 %v728_v33 }
  0x86   :  { %389 = vmatpush1.bf16.msra.mxu1 %v730_v34 }
  0x87   :  { %390 = vmatprep.subr.bf16.mxu1 %v731_v35 }
  0x8a   :  { %391 = vmatpush1.bf16.msra.mxu1 %v733_v36 }
 0x122   :  { %v145_v56 = vpop.f32.mrb[0].mxu0 }
 0x123   :  { %v146_v57 = vadd.f32 %v145_v56, %v90_v54  ;;  %v147_v58 = vpop.f32.mrb[1].mxu0 }
 0x124   :  { %v148_v59 = vadd.f32 %v147_v58, %v94_v55  ;;  %v149_v60 = vpop.f32.mrb[2].mxu0 }
 0x125   :  { %v152_v61 = vmax.f32 %v146_v57, 0.0  ;;  %v150_v62 = vpop.f32.mrb[3].mxu0 }
 0x126   :  { %v153_v63 = vmax.f32 %v148_v59, 0.0 }
 0x127   :  { %v154_v1 = vpack.c.bf16 %v152_v61, %v152_v61 }
 0x128   :  { %v155_v0 = vpack.c.bf16 %v153_v63, %v153_v63 }
 0x12a   :  { %392 = vmatprep.mubr.bf16.mxu1 %v155_v0 }
 0x12b   :  { %393 = vmatmul.mubr.bf16.vlgmr.msra.gmra.mrb[0].mxu1 %v154_v1 }
 0x1fe   :  { %v394_v9 = vpop.f32.mrb[0].mxu1 }
 0x1ff   :  { %v395_v10 = vadd.f32 %v394_v9, %v193_v7  ;;  %v396_v11 = vpop.f32.mrb[1].mxu1 }
 0x200   :  { %v397_v12 = vadd.f32 %v396_v11, %v197_v8  ;;  %v398_v13 = vpop.f32.mrb[2].mxu1 }
 0x201   :  { %v401_v14 = vmax.f32 %v395_v10, 0.0  ;;  %v399_v15 = vpop.f32.mrb[3].mxu1 }
 0x202   :  { %v402_v16 = vmax.f32 %v397_v12, 0.0 }
 0x203   :  { %v403_v18 = vpack.c.bf16 %v401_v14, %v401_v14 }
 0x204   :  { %v404_v17 = vpack.c.bf16 %v402_v16, %v402_v16 }
 0x206   :  { %572 = vmatprep.mubr.bf16.mxu0 %v404_v17 }
 0x207   :  { %573 = vmatmul.mubr.bf16.vlgmr.msra.gmra.mrb[4].mxu0 %v403_v18 }
 0x2da   :  { %v667_v19 = vpop.f32.mrb[4].mxu0 }
 0x2db   :  { %v668_v21 = vpop.f32.mrb[5].mxu0 }
 0x2dc   :  { %v669_v22 = vadd.f32 %v668_v21, %v667_v19  ;;  %v670_v23 = vpop.f32.mrb[6].mxu0 }
 0x2dd   :  { %v671_v24 = vpop.f32.mrb[7].mxu0 }
 0x2de   :  { %v575_v25 = vadd.f32 %v669_v22, %v634_v20 }
 0x2e0   :  { %581 = vst.msk [vmem:[#allocation10] sm:$0xf] %vm580_vm1, %v575_v25 }
 0x2e1   :  { %849 = shalt.err (!%p846_p8)
}
 0x2e2   :  { %s850_s6 = scalar_lea.hbm %s1000_s7, 64 }
 0x2e3   :  { %p851_p9 = scmp.ne.s32.totalorder %s1000_s7, %s850_s6  ;;  %p854_p10 = scmp.lt.u32.totalorder %s850_s6, %s1000_s7 }
 0x2e5   :  { %p856_p11 = pnand %p854_p10, %p851_p9 }
 0x2e7   :  { %859 = shalt.err (!%p856_p11)
}
 0x2e8   :  { %591 = dma.vmem_to_hbm [thread:$0]  %s589_s30, 64, %s1000_s7, [#allocation4]  }
 0x2e9   :  { %866 = dma.done.wait [#allocation4], 64  }
 0x2ea   :  { %867 = vsyncadd [#allocation4], 4294967232 }
 0x2eb   :  { %595 = vsyncpa [#allocation3], 1 }
 0x2ec   :  { %596 = vsyncpa [#allocation6], 1 }
 0x2ed   :  { %597 = vsyncpa [#allocation9], 1 }
 0x2ee   :  { %598 = vsyncpa [#allocation4], 1 }

</bundles_post_ra>
